<compile_context>
chip_gen: v5e
topology: v5e:2x2
jax: 0.10.0
libtpu: 0.0.40
codegen_flags: <defaults>
</compile_context>

<pallas_src>
import functools

import jax
import jax.numpy as jnp
from jax.experimental import pallas as pl
from jax.experimental.pallas import tpu as pltpu

IN_F = 128
EMBED = 256
OUT_F = 2
PAD_OUT = 128          # lane-dense output width; real outputs live in [:, :OUT_F]
DEFAULT_TB = 512       # batch tile: big enough to hide per-step overhead, tiny vs 64 MiB VMEM


def _round_up(n, m):
    return ((n + m - 1) // m) * m


def _embed_kernel(alpha_ref, x_ref, w1_ref, b1_ref, w2_ref, b2_ref, out_ref):
    # Layer 1: (TB, 128) bf16 @ (128, 256) bf16 -> f32 accumulate on the MXU.
    h = jnp.dot(x_ref[...], w1_ref[...], preferred_element_type=jnp.float32)
    h = h + b1_ref[...]

    # PReLU with a single shared alpha (scalar read from SMEM), f32 on the VPU.
    alpha = alpha_ref[0, 0]
    h = jnp.where(h >= 0.0, h, alpha * h)

    # Layer 2: lane-dense padded output (TB, 128); columns >= OUT_F are exact zeros + 0 bias.
    y = jnp.dot(h.astype(w2_ref.dtype), w2_ref[...], preferred_element_type=jnp.float32)
    out_ref[...] = (y + b2_ref[...]).astype(out_ref.dtype)


def prepare_params(w1, b1, alpha, w2, b2):
    """Convert f32 params (pre-transposed to (in, out)) into the kernel layout:
    bf16 matmul operands, zero-padded lane-dense second layer, f32 biases, SMEM alpha."""
    w1_k = w1.astype(jnp.bfloat16)                                      # (128, 256)
    b1_k = b1.reshape(1, EMBED).astype(jnp.float32)                     # (1, 256)
    alpha_k = jnp.asarray(alpha, jnp.float32).reshape(1, 1)             # (1, 1) -> SMEM
    w2_k = (jnp.zeros((EMBED, PAD_OUT), jnp.float32)
            .at[:, :OUT_F].set(w2).astype(jnp.bfloat16))                # (256, 128)
    b2_k = jnp.zeros((1, PAD_OUT), jnp.float32).at[0, :OUT_F].set(b2)   # (1, 128)
    return w1_k, b1_k, alpha_k, w2_k, b2_k


@functools.partial(jax.jit, static_argnames=("block_b",))
def embedding_net_forward(x, w1_k, b1_k, alpha_k, w2_k, b2_k, *, block_b=DEFAULT_TB):
    """x: (B, 128) f32. Returns (B, 2) f32 embedding."""
    B = x.shape[0]
    tb = min(block_b, _round_up(B, 8))          # block rows must be a multiple of 8
    b_pad = _round_up(B, tb)

    xb = x.astype(jnp.bfloat16)                 # halve x HBM traffic; MXU is bf16-native
    if b_pad != B:
        xb = jnp.pad(xb, ((0, b_pad - B), (0, 0)))

    out = pl.pallas_call(
        _embed_kernel,
        out_shape=jax.ShapeDtypeStruct((b_pad, PAD_OUT), jnp.float32),
        grid=(b_pad // tb,),
        in_specs=[
            pl.BlockSpec(memory_space=pltpu.MemorySpace.SMEM),   # alpha scalar
            pl.BlockSpec((tb, IN_F), lambda i: (i, 0)),          # x tile (pipelined)
            pl.BlockSpec((IN_F, EMBED), lambda i: (0, 0)),       # weights stay VMEM-resident
            pl.BlockSpec((1, EMBED), lambda i: (0, 0)),
            pl.BlockSpec((EMBED, PAD_OUT), lambda i: (0, 0)),
            pl.BlockSpec((1, PAD_OUT), lambda i: (0, 0)),
        ],
        out_specs=pl.BlockSpec((tb, PAD_OUT), lambda i: (i, 0)),
        compiler_params=pltpu.CompilerParams(
            dimension_semantics=("parallel",)),                  # megacore split on v7x
    )(alpha_k, xb, w1_k, b1_k, w2_k, b2_k)

    return out[:B, :OUT_F]


def triplet_net_forward(x1, x2, x3, params):
    """TripletNet.forward: one fused pallas_call over the concatenated batch."""
    b1_, b2_ = x1.shape[0], x2.shape[0]
    x = jnp.concatenate([x1, x2, x3], axis=0)
    out = embedding_net_forward(x, *params)
    return out[:b1_], out[b1_:b1_ + b2_], out[b1_ + b2_:]


def init_params(key):
    """Mirror nn.Linear defaults (uniform bound = 1/sqrt(fan_in)) and nn.PReLU alpha=0.25.
    Weights stored pre-transposed: (in_features, out_features)."""
    k1, k2, k3, k4 = jax.random.split(key, 4)
    bound1 = 1.0 / jnp.sqrt(float(IN_F))
    w1 = jax.random.uniform(k1, (IN_F, EMBED), jnp.float32, -bound1, bound1)
    b1 = jax.random.uniform(k2, (EMBED,), jnp.float32, -bound1, bound1)
    bound2 = 1.0 / jnp.sqrt(float(EMBED))
    w2 = jax.random.uniform(k3, (EMBED, OUT_F), jnp.float32, -bound2, bound2)
    b2 = jax.random.uniform(k4, (OUT_F,), jnp.float32, -bound2, bound2)
    alpha = jnp.float32(0.25)
    return w1, b1, alpha, w2, b2


def reference_forward(x, w1, b1, alpha, w2, b2):
    """Pure-JAX reference with the same bf16 operand quantization / f32 accumulation."""
    h = jnp.dot(x.astype(jnp.bfloat16), w1.astype(jnp.bfloat16),
                preferred_element_type=jnp.float32) + b1
    h = jnp.where(h >= 0, h, alpha * h)
    y = jnp.dot(h.astype(jnp.bfloat16), w2.astype(jnp.bfloat16),
                preferred_element_type=jnp.float32) + b2
    return y


if __name__ == "__main__":
    key = jax.random.PRNGKey(0)
    kx1, kx2, kx3, kp = jax.random.split(key, 4)

    B = 8
    x1 = jax.random.normal(kx1, (B, IN_F), jnp.float32)
    x2 = jax.random.normal(kx2, (B, IN_F), jnp.float32)
    x3 = jax.random.normal(kx3, (B, IN_F), jnp.float32)

    w1, b1, alpha, w2, b2 = init_params(kp)
    params = prepare_params(w1, b1, alpha, w2, b2)

    o1, o2, o3 = triplet_net_forward(x1, x2, x3, params)
    (o1, o2, o3) = jax.block_until_ready((o1, o2, o3))

    for x, o in ((x1, o1), (x2, o2), (x3, o3)):
        ref = reference_forward(x, w1, b1, alpha, w2, b2)
        assert o.shape == (B, OUT_F), o.shape
        assert jnp.allclose(o, ref, atol=5e-3, rtol=5e-3), jnp.max(jnp.abs(o - ref))

    print("KERNEL_OK")
</pallas_src>

<mosaic_0001>
module attributes {stable_mosaic.version = 11 : i64} {
  func.func @_embed_kernel(%arg0: i32, %arg1: memref<1x1xf32, #tpu.memory_space<smem>>, %arg2: memref<24x128xbf16, #tpu.memory_space<vmem>>, %arg3: memref<128x256xbf16, #tpu.memory_space<vmem>>, %arg4: memref<1x256xf32, #tpu.memory_space<vmem>>, %arg5: memref<256x128xbf16, #tpu.memory_space<vmem>>, %arg6: memref<1x128xf32, #tpu.memory_space<vmem>>, %arg7: memref<24x128xf32, #tpu.memory_space<vmem>>) attributes {dimension_semantics = [#tpu.dimension_semantics<parallel>], iteration_bounds = array<i64: 1>, scalar_prefetch = 0 : i64, scratch_operands = 0 : i64, tpu.core_type = #tpu.core_type<tc>, window_params = [{transform_indices = @transform_0, window_bounds = array<i64: 1, 1>}, {transform_indices = @transform_1, window_bounds = array<i64: 24, 128>}, {pipeline_mode = #tpu.pipeline_mode<synchronous>, transform_indices = @transform_2, window_bounds = array<i64: 128, 256>}, {pipeline_mode = #tpu.pipeline_mode<synchronous>, transform_indices = @transform_3, window_bounds = array<i64: 1, 256>}, {pipeline_mode = #tpu.pipeline_mode<synchronous>, transform_indices = @transform_4, window_bounds = array<i64: 256, 128>}, {pipeline_mode = #tpu.pipeline_mode<synchronous>, transform_indices = @transform_5, window_bounds = array<i64: 1, 128>}, {transform_indices = @transform_6, window_bounds = array<i64: 24, 128>}]} {
    %c0 = arith.constant 0 : index
    %c0_0 = arith.constant 0 : index
    %0 = vector.load %arg2[%c0, %c0_0] : memref<24x128xbf16, #tpu.memory_space<vmem>>, vector<24x128xbf16>
    %c0_1 = arith.constant 0 : index
    %c0_2 = arith.constant 0 : index
    %1 = vector.load %arg3[%c0_1, %c0_2] : memref<128x256xbf16, #tpu.memory_space<vmem>>, vector<128x256xbf16>
    %cst = arith.constant dense<0.000000e+00> : vector<24x256xf32>
    %2 = tpu.matmul %0, %1, %cst {dimension_numbers = #tpu.dot_dimension_numbers<[1], [0], [0], [1], [0, 0, 1, 1], [], []>} : vector<24x128xbf16>, vector<128x256xbf16>, vector<24x256xf32> -> vector<24x256xf32>
    %c0_3 = arith.constant 0 : index
    %c0_4 = arith.constant 0 : index
    %3 = vector.load %arg4[%c0_3, %c0_4] : memref<1x256xf32, #tpu.memory_space<vmem>>, vector<1x256xf32>
    %4 = vector.broadcast %3 : vector<1x256xf32> to vector<24x256xf32>
    %5 = arith.addf %2, %4 : vector<24x256xf32>
    %c0_5 = arith.constant 0 : index
    %c0_6 = arith.constant 0 : index
    %6 = memref.load %arg1[%c0_5, %c0_6] : memref<1x1xf32, #tpu.memory_space<smem>>
    %cst_7 = arith.constant 0.000000e+00 : f32
    %7 = vector.broadcast %cst_7 : f32 to vector<24x256xf32>
    %8 = arith.cmpf oge, %5, %7 : vector<24x256xf32>
    %9 = vector.broadcast %6 : f32 to vector<24x256xf32>
    %10 = arith.mulf %9, %5 : vector<24x256xf32>
    %11 = arith.select %8, %5, %10 : vector<24x256xi1>, vector<24x256xf32>
    %12 = arith.truncf %11 : vector<24x256xf32> to vector<24x256xbf16>
    %c0_8 = arith.constant 0 : index
    %c0_9 = arith.constant 0 : index
    %13 = vector.load %arg5[%c0_8, %c0_9] : memref<256x128xbf16, #tpu.memory_space<vmem>>, vector<256x128xbf16>
    %cst_10 = arith.constant dense<0.000000e+00> : vector<24x128xf32>
    %14 = tpu.matmul %12, %13, %cst_10 {dimension_numbers = #tpu.dot_dimension_numbers<[1], [0], [0], [1], [0, 0, 1, 1], [], []>} : vector<24x256xbf16>, vector<256x128xbf16>, vector<24x128xf32> -> vector<24x128xf32>
    %c0_11 = arith.constant 0 : index
    %c0_12 = arith.constant 0 : index
    %15 = vector.load %arg6[%c0_11, %c0_12] : memref<1x128xf32, #tpu.memory_space<vmem>>, vector<1x128xf32>
    %16 = vector.broadcast %15 : vector<1x128xf32> to vector<24x128xf32>
    %17 = arith.addf %14, %16 : vector<24x128xf32>
    %c0_13 = arith.constant 0 : index
    %c0_14 = arith.constant 0 : index
    %18 = vector.load %arg7[%c0_13, %c0_14] : memref<24x128xf32, #tpu.memory_space<vmem>>, vector<24x128xf32>
    tpu.vector_store %arg7[%c0_13, %c0_14], %17 {strides = array<i32>} : memref<24x128xf32, #tpu.memory_space<vmem>>, vector<24x128xf32>,
    return
  }
  func.func @transform_0(%arg0: i32) -> (i32, i32) {
    %c0_i32 = arith.constant 0 : i32
    %c0_i32_0 = arith.constant 0 : i32
    %c0_i32_1 = arith.constant 0 : i32
    return %c0_i32, %c0_i32_0 : i32, i32
  }
  func.func @transform_1(%arg0: i32) -> (i32, i32) {
    %c0_i32 = arith.constant 0 : i32
    %c0_i32_0 = arith.constant 0 : i32
    return %arg0, %c0_i32 : i32, i32
  }
  func.func @transform_2(%arg0: i32) -> (i32, i32) {
    %c0_i32 = arith.constant 0 : i32
    %c0_i32_0 = arith.constant 0 : i32
    %c0_i32_1 = arith.constant 0 : i32
    return %c0_i32, %c0_i32_0 : i32, i32
  }
  func.func @transform_3(%arg0: i32) -> (i32, i32) {
    %c0_i32 = arith.constant 0 : i32
    %c0_i32_0 = arith.constant 0 : i32
    %c0_i32_1 = arith.constant 0 : i32
    return %c0_i32, %c0_i32_0 : i32, i32
  }
  func.func @transform_4(%arg0: i32) -> (i32, i32) {
    %c0_i32 = arith.constant 0 : i32
    %c0_i32_0 = arith.constant 0 : i32
    %c0_i32_1 = arith.constant 0 : i32
    return %c0_i32, %c0_i32_0 : i32, i32
  }
  func.func @transform_5(%arg0: i32) -> (i32, i32) {
    %c0_i32 = arith.constant 0 : i32
    %c0_i32_0 = arith.constant 0 : i32
    %c0_i32_1 = arith.constant 0 : i32
    return %c0_i32, %c0_i32_0 : i32, i32
  }
  func.func @transform_6(%arg0: i32) -> (i32, i32) {
    %c0_i32 = arith.constant 0 : i32
    %c0_i32_0 = arith.constant 0 : i32
    return %arg0, %c0_i32 : i32, i32
  }
}

</mosaic_0001>

<bundles_post_ra>
// kernel: embedding_net_forward.1
= control target key start
LH: loop header
LB: loop body
LE: loop exit
PB: predicated region body
PF: predicated region fallthrough
CT: control target
= control target key end

     0   :  { %12 = vsyncpa [#allocation4], 0  ;;  %s703_s0 = inlined_call_operand.<no memory space> [shape: f32[1,1], index: 0, kind: input, shape index: {}]   ;;  %s704_s1 = inlined_call_operand.vmem [shape: bf16[24,128], index: 1, kind: input, shape index: {}]   ;;  %s705_s2 = inlined_call_operand.hbm [shape: bf16[128,256], index: 2, kind: input, shape index: {}]   ;;  %s706_s3 = inlined_call_operand.vmem [shape: f32[1,256], index: 3, kind: input, shape index: {}]   ;;  %s707_s4 = inlined_call_operand.hbm [shape: bf16[256,128], index: 4, kind: input, shape index: {}]   ;;  %s708_s5 = inlined_call_operand.vmem [shape: f32[1,128], index: 5, kind: input, shape index: {}]   ;;  %s709_s6 = inlined_call_operand.vmem [shape: f32[24,128], index: 6, kind: output, shape index: {}]  }
   0x1   :  { %s22_s23 = sshll.u32 %s705_s2, 4  ;;  %s23_s23 = int_to_ptr.hbm [resolvable:$true] %s22_s23 }
   0x2   :  { %13 = vsyncpa [#allocation6], 0  ;;  %s632_s24 = smov [#allocation3]   ;;  %s37_s28 = sshll.u32 %s707_s4, 4  ;;  %s38_s28 = int_to_ptr.hbm [resolvable:$true] %s37_s28 }
   0x3   :  { %s24_s25 = sshll.u32 %s632_s24, 4  ;;  %s633_s29 = smov 128   ;;  %s25_s25 = int_to_ptr.vmem [resolvable:$true] %s24_s25 }
   0x4   :  { %s634_s30 = smov 8   ;;  %s635_s7 = smov [#allocation5]  }
   0x5   :  { %30 = dma.hbm_to_vmem [thread:$0]  %s23_s23, 2048, %s25_s25, [#allocation4], %s633_s29, %s633_s29, %s634_s30  }
   0x6   :  { %s39_s8 = sshll.u32 %s635_s7, 4  ;;  %s636_s9 = smov 64   ;;  %s40_s8 = int_to_ptr.vmem [resolvable:$true] %s39_s8 }
   0x7   :  { %s637_s10 = smov 4  }
   0x8   :  { %45 = dma.hbm_to_vmem [thread:$0]  %s38_s28, 2048, %s40_s8, [#allocation6], %s636_s9, %s636_s9, %s637_s10  }
   0x9   :  { %628 = dma.done.wait [#allocation4], 2048  }
   0xa   :  { %629 = vsyncadd [#allocation4], 4294965248 }
   0xb   :  { %630 = dma.done.wait [#allocation6], 2048  }
   0xc   :  { %631 = vsyncadd [#allocation6], 4294965248  ;;  %v470_v0 = vld [vmem:[#allocation3 + $0x70] sm:$0xf]  ;;  %v556_v1 = vld [vmem:[#allocation3 + $0x74] sm:$0xf0] }
   0xd   :  { %v555_v2 = vld [vmem:[#allocation3 + $0x74] sm:$0xf]  ;;  %v471_v3 = vor.u32 %v556_v1, %v470_v0  ;;  %v472_v4 = vld [vmem:[#allocation3 + $0x78] sm:$0xf0]  ;;  %v462_v5 = vld [vmem:[#allocation3 + $0x60] sm:$0xf] }
   0xe   :  { %v554_v6 = vld [vmem:[#allocation3 + $0x64] sm:$0xf0]  ;;  %v475_v7 = vor.u32 %v555_v2, %v472_v4  ;;  %v553_v8 = vld [vmem:[#allocation3 + $0x64] sm:$0xf]  ;;  %v464_v9 = vld [vmem:[#allocation3 + $0x68] sm:$0xf0] }
   0xf   :  { %171 = vmatpush.bf16.msra.mxu0 %v471_v3  ;;  %v463_v10 = vor.u32 %v554_v6, %v462_v5  ;;  %v467_v11 = vor.u32 %v553_v8, %v464_v9  ;;  %v454_v12 = vld [vmem:[#allocation3 + $0x50] sm:$0xf]  ;;  %v552_v13 = vld [vmem:[#allocation3 + $0x54] sm:$0xf0]  ;;  %v551_v14 = vld [vmem:[#allocation3 + $0x54] sm:$0xf] }
  0x10   :  { %189 = vmatpush.bf16.msra.mxu1 %v475_v7  ;;  %v456_v15 = vld [vmem:[#allocation3 + $0x58] sm:$0xf0]  ;;  %v455_v16 = vor.u32 %v552_v13, %v454_v12  ;;  %v446_v18 = vld [vmem:[#allocation3 + $0x40] sm:$0xf]  ;;  %v550_v19 = vld [vmem:[#allocation3 + $0x44] sm:$0xf0] }
  0x11   :  { %v459_v17 = vor.u32 %v551_v14, %v456_v15  ;;  %v549_v20 = vld [vmem:[#allocation3 + $0x44] sm:$0xf]  ;;  %v448_v21 = vld [vmem:[#allocation3 + $0x48] sm:$0xf0]  ;;  %v447_v22 = vor.u32 %v550_v19, %v446_v18  ;;  %v438_v24 = vld [vmem:[#allocation3 + $0x30] sm:$0xf] }
  0x12   :  { %v451_v23 = vor.u32 %v549_v20, %v448_v21  ;;  %v548_v25 = vld [vmem:[#allocation3 + $0x34] sm:$0xf0]  ;;  %v547_v26 = vld [vmem:[#allocation3 + $0x34] sm:$0xf]  ;;  %v440_v27 = vld [vmem:[#allocation3 + $0x38] sm:$0xf0] }
  0x13   :  { %172 = vmatpush.bf16.msra.mxu0 %v463_v10  ;;  %v439_v28 = vor.u32 %v548_v25, %v438_v24  ;;  %v443_v29 = vor.u32 %v547_v26, %v440_v27  ;;  %v430_v30 = vld [vmem:[#allocation3 + $0x20] sm:$0xf]  ;;  %v546_v31 = vld [vmem:[#allocation3 + $0x24] sm:$0xf0]  ;;  %v545_v32 = vld [vmem:[#allocation3 + $0x24] sm:$0xf]  ;;  %v214_v10 = vstv %s703_s0 }
  0x14   :  { %190 = vmatpush.bf16.msra.mxu1 %v467_v11  ;;  %v432_v33 = vld [vmem:[#allocation3 + $0x28] sm:$0xf0]  ;;  %v431_v34 = vor.u32 %v546_v31, %v430_v30  ;;  %v564_v35 = vld [vmem:[#allocation5 + $0x38] sm:$0xff]  ;;  %v422_v38 = vld [vmem:[#allocation3 + $0x10] sm:$0xf] }
  0x15   :  { %v572_v36 = vld [vmem:[#allocation5 + $0x78] sm:$0xff]  ;;  %v435_v37 = vor.u32 %v545_v32, %v432_v33  ;;  %v543_v40 = vld [vmem:[#allocation3 + $0x14] sm:$0xf]  ;;  %363 = vmatpush.bf16.msra.mxu2 %v564_v35  ;;  %v414_v46 = vld [vmem:[#allocation3] sm:$0xf] }
  0x16   :  { %v544_v39 = vld [vmem:[#allocation3 + $0x14] sm:$0xf0]  ;;  %v424_v41 = vld [vmem:[#allocation3 + $0x18] sm:$0xf0]  ;;  %381 = vmatpush.bf16.msra.mxu3 %v572_v36  ;;  %v563_v42 = vld [vmem:[#allocation5 + $0x30] sm:$0xff] }
  0x17   :  { %173 = vmatpush.bf16.msra.mxu0 %v455_v16  ;;  %v571_v43 = vld [vmem:[#allocation5 + $0x70] sm:$0xff]  ;;  %v423_v44 = vor.u32 %v544_v39, %v422_v38  ;;  %v427_v45 = vor.u32 %v543_v40, %v424_v41  ;;  %v542_v47 = vld [vmem:[#allocation3 + $0x4] sm:$0xf0]  ;;  %v541_v48 = vld [vmem:[#allocation3 + $0x4] sm:$0xf] }
  0x18   :  { %191 = vmatpush.bf16.msra.mxu1 %v459_v17  ;;  %v416_v49 = vld [vmem:[#allocation3 + $0x8] sm:$0xf0]  ;;  %v415_v52 = vor.u32 %v542_v47, %v414_v46  ;;  %v561_v54 = vld [vmem:[#allocation5 + $0x20] sm:$0xff]  ;;  %v58_v57 = vld [vmem:[%s704_s1 + $0x8] sm:$0xf] }
  0x19   :  { %364 = vmatpush.bf16.msra.mxu2 %v563_v42  ;;  %v562_v50 = vld [vmem:[#allocation5 + $0x28] sm:$0xff]  ;;  %v419_v53 = vor.u32 %v541_v48, %v416_v49  ;;  %v569_v55 = vld [vmem:[#allocation5 + $0x60] sm:$0xff]  ;;  %v86_v58 = vunpack.c.l.b16 %v58_v57  ;;  %v560_v60 = vld [vmem:[#allocation5 + $0x18] sm:$0xff] }
  0x1a   :  { %382 = vmatpush.bf16.msra.mxu3 %v571_v43  ;;  %v570_v51 = vld [vmem:[#allocation5 + $0x68] sm:$0xff]  ;;  %v540_v56 = vld [vmem:[%s704_s1] sm:$0xff]  ;;  %v568_v61 = vld [vmem:[#allocation5 + $0x58] sm:$0xff] }
  0x1b   :  { %174 = vmatpush.bf16.msra.mxu0 %v447_v22  ;;  %v88_v59 = vpack.c.b16 %v86_v58, %v86_v58  ;;  %v559_v62 = vld [vmem:[#allocation5 + $0x10] sm:$0xff]  ;;  %v558_v0 = vld [vmem:[#allocation5 + $0x8] sm:$0xff]  ;;  %v557_v2 = vld [vmem:[#allocation5] sm:$0xff] }
  0x1c   :  { %192 = vmatpush.bf16.msra.mxu1 %v451_v23  ;;  %v567_v63 = vld [vmem:[#allocation5 + $0x50] sm:$0xff]  ;;  %v566_v1 = vld [vmem:[#allocation5 + $0x48] sm:$0xff]  ;;  %v565_v3 = vld [vmem:[#allocation5 + $0x40] sm:$0xff] }
  0x1d   :  { %365 = vmatpush.bf16.msra.mxu2 %v562_v50  ;;  %v75_v4 = vld [vmem:[%s706_s3] sm:$0x3] }
  0x1e   :  { %383 = vmatpush.bf16.msra.mxu3 %v570_v51  ;;  %v77_v6 = vperm.slane %v75_v4, 0  ;;  %v78_v8 = vperm.slane %v75_v4, 1  ;;  %v579_v38 = vld [vmem:[%s708_s5] ss:$0 sm:$0xff] }
  0x1f   :  { %175 = vmatpush.bf16.msra.mxu0 %v439_v28 }
  0x20   :  { %193 = vmatpush.bf16.msra.mxu1 %v443_v29 }
  0x21   :  { %366 = vmatpush.bf16.msra.mxu2 %v561_v54 }
  0x22   :  { %384 = vmatpush.bf16.msra.mxu3 %v569_v55 }
  0x23   :  { %176 = vmatpush.bf16.msra.mxu0 %v431_v34 }
  0x24   :  { %194 = vmatpush.bf16.msra.mxu1 %v435_v37 }
  0x25   :  { %367 = vmatpush.bf16.msra.mxu2 %v560_v60 }
  0x26   :  { %385 = vmatpush.bf16.msra.mxu3 %v568_v61 }
  0x27   :  { %177 = vmatpush.bf16.msra.mxu0 %v423_v44 }
  0x28   :  { %195 = vmatpush.bf16.msra.mxu1 %v427_v45 }
  0x29   :  { %368 = vmatpush.bf16.msra.mxu2 %v559_v62 }
  0x2a   :  { %386 = vmatpush.bf16.msra.mxu3 %v567_v63 }
  0x2b   :  { %178 = vmatpush.bf16.msra.mxu0 %v415_v52 }
  0x2c   :  { %196 = vmatpush.bf16.msra.mxu1 %v419_v53 }
  0x2d   :  { %369 = vmatpush.bf16.msra.mxu2 %v558_v0 }
  0x2e   :  { %179 = vmatmul.bf16.vlgmr.msra.gmra.mxu0 %v540_v56  ;;  %387 = vmatpush.bf16.msra.mxu3 %v566_v1 }
  0x2f   :  { %197 = vmatmul.bf16.vlgmr.msra.gmra.mxu1 %v540_v56 }
  0x31   :  { %370 = vmatpush.bf16.msra.mxu2 %v557_v2 }
  0x32   :  { %388 = vmatpush.bf16.msra.mxu3 %v565_v3 }
  0x3e   :  { %184 = vmatmul.bf16.gmra.mxu0 %v88_v59 }
  0x3f   :  { %202 = vmatmul.bf16.gmra.mxu1 %v88_v59 }
  0xab   :  { %v180_v5 = vpop.f32.mrf.mxu0 }
  0xac   :  { %v198_v7 = vpop.f32.mrf.mxu1  ;;  %v181_v9 = vadd.f32 %v180_v5, %v77_v6 }
  0xad   :  { %v199_v11 = vadd.f32 %v198_v7, %v78_v8 }
  0xae   :  { %v215_v13 = vmul.f32 %v214_v10, %v181_v9  ;;  %vm208_vm0 = vcmp.ge.f32.partialorder %v181_v9, 0.0 }
  0xaf   :  { %v216_v16 = vmul.f32 %v214_v10, %v199_v11  ;;  %vm209_vm2 = vcmp.ge.f32.partialorder %v199_v11, 0.0 }
  0xb0   :  { %v221_v20 = vsel %vm208_vm0, %v181_v9, %v215_v13 }
  0xb1   :  { %v222_v23 = vsel %vm209_vm2, %v199_v11, %v216_v16 }
  0xb3   :  { %v182_v12 = vpop.f32.mrf.mxu0 }
  0xb4   :  { %v183_v14 = vadd.f32 %v182_v12, %v77_v6  ;;  %v200_v15 = vpop.f32.mrf.mxu1 }
  0xb5   :  { %v201_v17 = vadd.f32 %v200_v15, %v78_v8 }
  0xb6   :  { %v217_v18 = vmul.f32 %v214_v10, %v183_v14  ;;  %vm210_vm1 = vcmp.ge.f32.partialorder %v183_v14, 0.0 }
  0xb7   :  { %v218_v19 = vmul.f32 %v214_v10, %v201_v17  ;;  %vm211_vm3 = vcmp.ge.f32.partialorder %v201_v17, 0.0 }
  0xb8   :  { %v223_v21 = vsel %vm210_vm1, %v183_v14, %v217_v18 }
  0xb9   :  { %v227_v22 = vpack.c.bf16 %v223_v21, %v221_v20  ;;  %v224_v24 = vsel %vm211_vm3, %v201_v17, %v218_v19 }
  0xba   :  { %v228_v25 = vpack.c.bf16 %v224_v24, %v222_v23 }
  0xbb   :  { %v185_v26 = vpop.f32.mrf.mxu0  ;;  %371 = vmatmul.bf16.vlgmr.msra.gmra.mxu2 %v227_v22 }
  0xbc   :  { %v203_v27 = vpop.f32.mrf.mxu1  ;;  %389 = vmatmul.bf16.vlgmr.msra.gmra.mxu3 %v228_v25  ;;  %v186_v28 = vadd.f32 %v185_v26, %v77_v6 }
  0xbd   :  { %v204_v29 = vadd.f32 %v203_v27, %v78_v8 }
  0xbe   :  { %v219_v30 = vmul.f32 %v214_v10, %v186_v28  ;;  %vm212_vm4 = vcmp.ge.f32.partialorder %v186_v28, 0.0 }
  0xbf   :  { %v220_v31 = vmul.f32 %v214_v10, %v204_v29  ;;  %vm213_vm5 = vcmp.ge.f32.partialorder %v204_v29, 0.0 }
  0xc0   :  { %v225_v34 = vsel %vm212_vm4, %v186_v28, %v219_v30 }
  0xc1   :  { %v226_v35 = vsel %vm213_vm5, %v204_v29, %v220_v31  ;;  %v229_v36 = vpack.c.bf16 %v225_v34, %v225_v34 }
  0xc2   :  { %v230_v37 = vpack.c.bf16 %v226_v35, %v226_v35 }
  0xc3   :  { %v187_v32 = vpop.f32.mrf.mxu0 }
  0xc4   :  { %v205_v33 = vpop.f32.mrf.mxu1 }
  0xcb   :  { %376 = vmatmul.bf16.gmra.mxu2 %v229_v36 }
  0xcc   :  { %394 = vmatmul.bf16.gmra.mxu3 %v230_v37 }
 0x13e   :  { %v372_v39 = vpop.f32.mrf.mxu2 }
 0x13f   :  { %v373_v40 = vadd.f32 %v579_v38, %v372_v39  ;;  %v390_v41 = vpop.f32.mrf.mxu3 }
 0x141   :  { %v391_v42 = vadd.f32 %v390_v41, %v373_v40 }
 0x143   :  { %399 = vst [vmem:[%s709_s6] sm:$0xff] %v391_v42 }
 0x146   :  { %v374_v43 = vpop.f32.mrf.mxu2 }
 0x147   :  { %v375_v44 = vadd.f32 %v579_v38, %v374_v43  ;;  %v392_v45 = vpop.f32.mrf.mxu3 }
 0x149   :  { %v393_v46 = vadd.f32 %v392_v45, %v375_v44 }
 0x14b   :  { %400 = vst [vmem:[%s709_s6 + $0x8] sm:$0xff] %v393_v46 }
 0x14e   :  { %v377_v47 = vpop.f32.mrf.mxu2 }
 0x14f   :  { %v378_v48 = vadd.f32 %v579_v38, %v377_v47  ;;  %v395_v49 = vpop.f32.mrf.mxu3 }
 0x151   :  { %v396_v50 = vadd.f32 %v395_v49, %v378_v48 }
 0x153   :  { %401 = vst [vmem:[%s709_s6 + $0x10] sm:$0xff] %v396_v50 }
 0x156   :  { %v379_v51 = vpop.f32.mrf.mxu2 }
 0x157   :  { %v397_v52 = vpop.f32.mrf.mxu3 }
 0x158   :  { %406 = vsyncpa [#allocation4], 1 }
 0x159   :  { %407 = vsyncpa [#allocation6], 1 }

</bundles_post_ra>
